<compile_context>
chip_gen: v5e
topology: v5e:2x2
jax: 0.10.0
libtpu: 0.0.40
codegen_flags: <defaults>
</compile_context>

<pallas_src>
import functools

import jax
import jax.numpy as jnp
from jax.experimental import pallas as pl
from jax.experimental.pallas import tpu as pltpu


def _round_up(x, m):
    return ((x + m - 1) // m) * m


# ---------------------------------------------------------------------------
# Kernel
# ---------------------------------------------------------------------------
def _mfq_kernel(obs_ref, am_ref, ids_ref, w_ref, b_ref, q_ref, act_ref, *,
                obs_dim, n_act, n_agents, o_am, o_id, o_q1, o_q2, o_q3, ha, n_out):
    """Fused MFQ forward for one batch tile.

    obs_ref : (TB, obs_dim)      raw observations
    am_ref  : (TB, n_act)        mean actions of neighbours
    ids_ref : (TB, n_agents)     one-hot agent ids
    w_ref   : (o_q1 + 3*ha, ha)  packed weight slab (compute dtype):
                rows [0, obs_dim)            W_rep                      (layer A, block-diag)
                rows [o_am, o_am+n_act)      W_emb (action-mean part)
                rows [o_id, o_id+n_agents)   W_emb (agent-id part) | I  (agent-id passthrough)
                rows [o_q1, o_q1+ha)         fused Q-head hidden-1 weight
                rows [o_q2, o_q2+ha)         Q-head hidden-2 weight
                rows [o_q3, o_q3+ha)         Q-head output weight
    b_ref   : (4, ha) f32        packed biases, one row per layer (A, q1, q2, q3)
    q_ref   : (TB, ha)           Q values in lanes [0, n_out), zeros elsewhere (lane-dense store)
    act_ref : (TB, 1) int32      greedy action (argmax on the f32 accumulator, first max index)
    """
    f32 = jnp.float32
    cdt = w_ref.dtype

    obs = obs_ref[...].astype(cdt)
    am = am_ref[...].astype(cdt)
    ids = ids_ref[...].astype(cdt)

    # Fused layer A (block-diagonal): lanes [0,rep_h)=state MLP, [rep_h,rep_h+emb_h)=action-mean
    # embedding MLP, next n_agents lanes = agent-id passthrough, remaining lanes exactly zero.
    # Plain full-row ReLU is exact: ids are one-hot (>= 0), passthrough/padded lanes have zero
    # weights and zero bias.
    pre_a = (jnp.dot(obs, w_ref[0:obs_dim, :], preferred_element_type=f32)
             + jnp.dot(am, w_ref[o_am:o_am + n_act, :], preferred_element_type=f32)
             + jnp.dot(ids, w_ref[o_id:o_id + n_agents, :], preferred_element_type=f32)
             + b_ref[0:1, :])
    h_a = jnp.maximum(pre_a, 0.0).astype(cdt)

    # BasicQhead hidden layers.
    h1 = jnp.maximum(
        jnp.dot(h_a, w_ref[o_q1:o_q1 + ha, :], preferred_element_type=f32) + b_ref[1:2, :], 0.0
    ).astype(cdt)
    h2 = jnp.maximum(
        jnp.dot(h1, w_ref[o_q2:o_q2 + ha, :], preferred_element_type=f32) + b_ref[2:3, :], 0.0
    ).astype(cdt)

    # Output layer (no activation), lane-dense 128-wide store.
    q = jnp.dot(h2, w_ref[o_q3:o_q3 + ha, :], preferred_element_type=f32) + b_ref[3:4, :]
    q_ref[...] = q.astype(q_ref.dtype)

    # Greedy argmax in-kernel on the f32 accumulator (exact regardless of q_ref dtype; avoids a
    # wrapper-side re-read of the Q slab).  Ties resolve to the lowest index, like jnp/torch argmax.
    lane = jax.lax.broadcasted_iota(jnp.int32, q.shape, 1)
    q_valid = jnp.where(lane < n_out, q, -jnp.inf)
    q_max = jnp.max(q_valid, axis=-1, keepdims=True)
    first_max = jnp.min(jnp.where(q_valid == q_max, lane, ha), axis=-1, keepdims=True)
    act_ref[...] = first_max.astype(jnp.int32)


# ---------------------------------------------------------------------------
# Parameter packing — run ONCE per parameter update, NOT in the per-step forward path.
# ---------------------------------------------------------------------------
def pack_mfq_params(params, compute_dtype=jnp.bfloat16):
    """Pack the 13 MFQ parameter tensors into one weight slab + one bias slab (2 DMAs total)."""
    f32 = jnp.float32
    obs_dim, rep_h = params["w_rep"].shape
    n_act, emb_h = params["w_emb_a"].shape
    n_agents = params["w_emb_id"].shape[0]
    q_h = params["w_q2"].shape[0]
    n_out = params["w_q3"].shape[1]

    ha = _round_up(max(rep_h + emb_h + n_agents, q_h, n_out), 128)   # padded hidden / lane width
    o_am = _round_up(obs_dim, 16)                                    # 16-row blocks: bf16-safe slices
    o_id = o_am + _round_up(n_act, 16)
    o_q1 = o_id + _round_up(n_agents, 16)
    o_q2, o_q3 = o_q1 + ha, o_q1 + 2 * ha
    rows = o_q1 + 3 * ha

    w = jnp.zeros((rows, ha), f32)
    # layer A (block-diagonal)
    w = w.at[0:obs_dim, 0:rep_h].set(params["w_rep"].astype(f32))
    w = w.at[o_am:o_am + n_act, rep_h:rep_h + emb_h].set(params["w_emb_a"].astype(f32))
    w = w.at[o_id:o_id + n_agents, rep_h:rep_h + emb_h].set(params["w_emb_id"].astype(f32))
    w = w.at[o_id:o_id + n_agents,
             rep_h + emb_h:rep_h + emb_h + n_agents].set(jnp.eye(n_agents, dtype=f32))
    # Q-head layer 1 (fused concat-split matmul)
    w = w.at[o_q1:o_q1 + rep_h, 0:q_h].set(params["w_q1_s"].astype(f32))
    w = w.at[o_q1 + rep_h:o_q1 + rep_h + emb_h, 0:q_h].set(params["w_q1_e"].astype(f32))
    w = w.at[o_q1 + rep_h + emb_h:o_q1 + rep_h + emb_h + n_agents,
             0:q_h].set(params["w_q1_id"].astype(f32))
    # Q-head layers 2 / 3
    w = w.at[o_q2:o_q2 + q_h, 0:q_h].set(params["w_q2"].astype(f32))
    w = w.at[o_q3:o_q3 + q_h, 0:n_out].set(params["w_q3"].astype(f32))
    w_slab = w.astype(compute_dtype)

    b = jnp.zeros((4, ha), f32)
    b = b.at[0, 0:rep_h].set(params["b_rep"].reshape(-1).astype(f32))
    b = b.at[0, rep_h:rep_h + emb_h].set(params["b_emb"].reshape(-1).astype(f32))
    b = b.at[1, 0:q_h].set(params["b_q1"].reshape(-1).astype(f32))
    b = b.at[2, 0:q_h].set(params["b_q2"].reshape(-1).astype(f32))
    b = b.at[3, 0:n_out].set(params["b_q3"].reshape(-1).astype(f32))
    return w_slab, b


# ---------------------------------------------------------------------------
# Forward wrapper (hot path)
# ---------------------------------------------------------------------------
@functools.partial(jax.jit, static_argnames=("n_actions", "block_rows", "q_out_dtype"))
def mfq_forward(obs, actions_mean, agent_ids, w_slab, b_slab, *, n_actions,
                block_rows=2048, q_out_dtype=jnp.float32):
    """MFQnetwork.forward hot path (single model key, parameter sharing, greedy, no RNN).

    Returns (rnn_hidden_new, argmax_action, evalQ) mirroring MFQnetwork.forward for one key.
    """
    B, obs_dim = obs.shape
    n_act = actions_mean.shape[1]
    n_agents = agent_ids.shape[1]

    ha = w_slab.shape[1]
    o_am = _round_up(obs_dim, 16)
    o_id = o_am + _round_up(n_act, 16)
    o_q1 = o_id + _round_up(n_agents, 16)
    o_q2, o_q3 = o_q1 + ha, o_q1 + 2 * ha
    assert w_slab.shape[0] == o_q1 + 3 * ha and b_slab.shape == (4, ha), "slab layout mismatch"

    # Batch tiling: big tiles to amortise the ~0.35us per-step overhead, but keep >= 2 grid steps
    # whenever the batch allows so dimension_semantics=("parallel",) can use both TCs on v7x.
    tb_half = _round_up(max((B + 1) // 2, 8), 8)
    tb = max(8, min(_round_up(block_rows, 8), tb_half))
    bp = _round_up(B, tb)
    if bp != B:  # pad rows only; no concat/cast pass over the activations
        pad = ((0, bp - B), (0, 0))
        obs = jnp.pad(obs, pad)
        actions_mean = jnp.pad(actions_mean, pad)
        agent_ids = jnp.pad(agent_ids, pad)

    kernel = functools.partial(
        _mfq_kernel, obs_dim=obs_dim, n_act=n_act, n_agents=n_agents,
        o_am=o_am, o_id=o_id, o_q1=o_q1, o_q2=o_q2, o_q3=o_q3, ha=ha, n_out=n_actions)

    q_pad, act_pad = pl.pallas_call(
        kernel,
        out_shape=(jax.ShapeDtypeStruct((bp, ha), q_out_dtype),
                   jax.ShapeDtypeStruct((bp, 1), jnp.int32)),
        grid=(bp // tb,),
        in_specs=[
            pl.BlockSpec((tb, obs_dim), lambda i: (i, 0)),        # batch-tiled activations
            pl.BlockSpec((tb, n_act), lambda i: (i, 0)),
            pl.BlockSpec((tb, n_agents), lambda i: (i, 0)),
            pl.BlockSpec((o_q1 + 3 * ha, ha), lambda i: (0, 0)),  # weight slab: VMEM-resident
            pl.BlockSpec((4, ha), lambda i: (0, 0)),              # bias slab:   VMEM-resident
        ],
        out_specs=(pl.BlockSpec((tb, ha), lambda i: (i, 0)),      # lane-dense 128-wide Q store
                   pl.BlockSpec((tb, 1), lambda i: (i, 0))),      # tiny int32 greedy-action store
        compiler_params=pltpu.CompilerParams(
            dimension_semantics=("parallel",),
            # NOTE: default block_rows=2048 uses ~3 MiB VMEM (fits every generation's scoped
            # default).  If you raise block_rows past ~4096 on v5e (16 MiB scoped default), also
            # set vmem_limit_bytes here.
        ),
    )(obs, actions_mean, agent_ids, w_slab, b_slab)

    evalQ = q_pad[:B, :n_actions]
    actions = act_pad[:B, 0]
    rnn_hidden_new = [None, None]
    # TODO(synk): Boltzmann Categorical sampling, avail_actions masking and the RNN representation
    # path of MFQnetwork.forward are not implemented (greedy, feed-forward path only).
    return rnn_hidden_new, actions, evalQ


# ---------------------------------------------------------------------------
# Pure-JAX reference (mirrors the PyTorch module math)
# ---------------------------------------------------------------------------
def reference_forward(obs, actions_mean, agent_ids, params):
    state = jnp.maximum(obs @ params["w_rep"] + params["b_rep"], 0.0)
    emb_in = jnp.concatenate([actions_mean, agent_ids], axis=-1)
    w_emb = jnp.concatenate([params["w_emb_a"], params["w_emb_id"]], axis=0)
    emb = jnp.maximum(emb_in @ w_emb + params["b_emb"], 0.0)
    q_in = jnp.concatenate([state, emb, agent_ids], axis=-1)
    w_q1 = jnp.concatenate([params["w_q1_s"], params["w_q1_e"], params["w_q1_id"]], axis=0)
    h1 = jnp.maximum(q_in @ w_q1 + params["b_q1"], 0.0)
    h2 = jnp.maximum(h1 @ params["w_q2"] + params["b_q2"], 0.0)
    q = h2 @ params["w_q3"] + params["b_q3"]
    return jnp.argmax(q, axis=-1), q


if __name__ == "__main__":
    # ----- module hyperparameters (small, consistent with MFQnetwork.__init__) -----
    n_agents = 4
    n_actions_max = 8          # action_space[key].n
    obs_dim = 16
    rep_hidden = 32            # representation output_shapes['state'][0]
    emb_hidden = 32            # kwargs['action_embedding_hidden_size'][-1]
    q_hidden = 32              # hidden_size for BasicQhead
    batch = 2
    B = batch * n_agents       # flattened (batch, agents) rows, parameter sharing

    dim_in_emb = n_actions_max + n_agents
    dim_in_q = rep_hidden + emb_hidden + n_agents

    key = jax.random.PRNGKey(0)
    ks = jax.random.split(key, 20)

    def init(k, shape, fan_in):
        return jax.random.normal(k, shape, jnp.float32) / jnp.sqrt(jnp.float32(fan_in))

    params = {
        "w_rep":    init(ks[0], (obs_dim, rep_hidden), obs_dim),
        "b_rep":    init(ks[1], (1, rep_hidden), rep_hidden),
        "w_emb_a":  init(ks[2], (n_actions_max, emb_hidden), dim_in_emb),
        "w_emb_id": init(ks[3], (n_agents, emb_hidden), dim_in_emb),
        "b_emb":    init(ks[4], (1, emb_hidden), emb_hidden),
        "w_q1_s":   init(ks[5], (rep_hidden, q_hidden), dim_in_q),
        "w_q1_e":   init(ks[6], (emb_hidden, q_hidden), dim_in_q),
        "w_q1_id":  init(ks[7], (n_agents, q_hidden), dim_in_q),
        "b_q1":     init(ks[8], (1, q_hidden), q_hidden),
        "w_q2":     init(ks[9], (q_hidden, q_hidden), q_hidden),
        "b_q2":     init(ks[10], (1, q_hidden), q_hidden),
        "w_q3":     init(ks[11], (q_hidden, n_actions_max), q_hidden),
        "b_q3":     init(ks[12], (1, n_actions_max), n_actions_max),
    }

    # ----- deterministic example inputs -----
    obs = jax.random.normal(ks[13], (B, obs_dim), jnp.float32)
    actions_mean = jax.nn.softmax(
        jax.random.normal(ks[14], (B, n_actions_max), jnp.float32), axis=-1)
    agent_ids = jnp.tile(jnp.eye(n_agents, dtype=jnp.float32), (batch, 1))

    ref_actions, ref_q = reference_forward(obs, actions_mean, agent_ids, params)

    # --- f32 path: exact-semantics check (f32 weights, f32 Q writeback) ---
    w32, b32 = pack_mfq_params(params, compute_dtype=jnp.float32)   # once per param update
    _, actions, evalQ = mfq_forward(obs, actions_mean, agent_ids, w32, b32,
                                    n_actions=n_actions_max, q_out_dtype=jnp.float32)
    jax.block_until_ready((actions, evalQ))
    assert evalQ.shape == (B, n_actions_max)
    assert jnp.allclose(evalQ, ref_q, atol=1e-4, rtol=1e-4), "Q mismatch (f32)"
    assert jnp.array_equal(actions.astype(jnp.int32),
                           ref_actions.astype(jnp.int32)), "argmax mismatch (f32)"

    # --- production config: bf16 weights/activations, bf16 Q writeback, exact in-kernel argmax ---
    wbf, bbf = pack_mfq_params(params, compute_dtype=jnp.bfloat16)
    _, actions_bf, q_bf = mfq_forward(obs, actions_mean, agent_ids, wbf, bbf,
                                      n_actions=n_actions_max, q_out_dtype=jnp.bfloat16)
    jax.block_until_ready((actions_bf, q_bf))
    assert q_bf.shape == (B, n_actions_max)
    assert float(jnp.max(jnp.abs(q_bf.astype(jnp.float32) - ref_q))) < 0.15, "Q mismatch (bf16)"

    # --- larger batch: exercises a multi-step batch grid (>=2 tiles) + row padding (f32, tight) ---
    B2 = 328  # not tile-aligned -> exercises row padding; split into 2 tiles for megacore
    obs2 = jax.random.normal(ks[15], (B2, obs_dim), jnp.float32)
    am2 = jax.nn.softmax(jax.random.normal(ks[16], (B2, n_actions_max), jnp.float32), axis=-1)
    ids2 = jnp.tile(jnp.eye(n_agents, dtype=jnp.float32), (B2 // n_agents, 1))
    _, a2, q2 = mfq_forward(obs2, am2, ids2, w32, b32,
                            n_actions=n_actions_max, q_out_dtype=jnp.float32)
    jax.block_until_ready((a2, q2))
    ra2, rq2 = reference_forward(obs2, am2, ids2, params)
    assert q2.shape == (B2, n_actions_max)
    assert jnp.allclose(q2, rq2, atol=1e-4, rtol=1e-4), "Q mismatch (f32, large batch)"
    assert jnp.array_equal(a2.astype(jnp.int32), ra2.astype(jnp.int32)), \
        "argmax mismatch (f32, large batch)"

    print("KERNEL_OK")
</pallas_src>

<mosaic_0001>
module attributes {stable_mosaic.version = 11 : i64} {
  func.func @_mfq_kernel(%arg0: i32, %arg1: memref<8x16xf32, #tpu.memory_space<vmem>>, %arg2: memref<8x8xf32, #tpu.memory_space<vmem>>, %arg3: memref<8x4xf32, #tpu.memory_space<vmem>>, %arg4: memref<432x128xf32, #tpu.memory_space<vmem>>, %arg5: memref<4x128xf32, #tpu.memory_space<vmem>>, %arg6: memref<8x128xf32, #tpu.memory_space<vmem>>, %arg7: memref<8x1xi32, #tpu.memory_space<vmem>>) attributes {dimension_semantics = [#tpu.dimension_semantics<parallel>], iteration_bounds = array<i64: 1>, scalar_prefetch = 0 : i64, scratch_operands = 0 : i64, tpu.core_type = #tpu.core_type<tc>, window_params = [{transform_indices = @transform_0, window_bounds = array<i64: 8, 16>}, {transform_indices = @transform_1, window_bounds = array<i64: 8, 8>}, {transform_indices = @transform_2, window_bounds = array<i64: 8, 4>}, {pipeline_mode = #tpu.pipeline_mode<synchronous>, transform_indices = @transform_3, window_bounds = array<i64: 432, 128>}, {pipeline_mode = #tpu.pipeline_mode<synchronous>, transform_indices = @transform_4, window_bounds = array<i64: 4, 128>}, {transform_indices = @transform_5, window_bounds = array<i64: 8, 128>}, {transform_indices = @transform_6, window_bounds = array<i64: 8, 1>}]} {
    %c0 = arith.constant 0 : index
    %c0_0 = arith.constant 0 : index
    %0 = vector.load %arg1[%c0, %c0_0] : memref<8x16xf32, #tpu.memory_space<vmem>>, vector<8x16xf32>
    %c0_1 = arith.constant 0 : index
    %c0_2 = arith.constant 0 : index
    %1 = vector.load %arg2[%c0_1, %c0_2] : memref<8x8xf32, #tpu.memory_space<vmem>>, vector<8x8xf32>
    %c0_3 = arith.constant 0 : index
    %c0_4 = arith.constant 0 : index
    %2 = vector.load %arg3[%c0_3, %c0_4] : memref<8x4xf32, #tpu.memory_space<vmem>>, vector<8x4xf32>
    %c0_5 = arith.constant 0 : index
    %c0_6 = arith.constant 0 : index
    %3 = vector.load %arg4[%c0_5, %c0_6] : memref<432x128xf32, #tpu.memory_space<vmem>>, vector<16x128xf32>
    %cst = arith.constant dense<0.000000e+00> : vector<8x128xf32>
    %4 = tpu.matmul %0, %3, %cst {dimension_numbers = #tpu.dot_dimension_numbers<[1], [0], [0], [1], [0, 0, 1, 1], [], []>} : vector<8x16xf32>, vector<16x128xf32>, vector<8x128xf32> -> vector<8x128xf32>
    %c16 = arith.constant 16 : index
    %c0_7 = arith.constant 0 : index
    %5 = vector.load %arg4[%c16, %c0_7] : memref<432x128xf32, #tpu.memory_space<vmem>>, vector<8x128xf32>
    %cst_8 = arith.constant dense<0.000000e+00> : vector<8x128xf32>
    %6 = tpu.matmul %1, %5, %cst_8 {dimension_numbers = #tpu.dot_dimension_numbers<[1], [0], [0], [1], [0, 0, 1, 1], [], []>} : vector<8x8xf32>, vector<8x128xf32>, vector<8x128xf32> -> vector<8x128xf32>
    %7 = arith.addf %4, %6 : vector<8x128xf32>
    %c32 = arith.constant 32 : index
    %c0_9 = arith.constant 0 : index
    %8 = vector.load %arg4[%c32, %c0_9] : memref<432x128xf32, #tpu.memory_space<vmem>>, vector<4x128xf32>
    %cst_10 = arith.constant dense<0.000000e+00> : vector<8x128xf32>
    %9 = tpu.matmul %2, %8, %cst_10 {dimension_numbers = #tpu.dot_dimension_numbers<[1], [0], [0], [1], [0, 0, 1, 1], [], []>} : vector<8x4xf32>, vector<4x128xf32>, vector<8x128xf32> -> vector<8x128xf32>
    %10 = arith.addf %7, %9 : vector<8x128xf32>
    %c0_11 = arith.constant 0 : index
    %c0_12 = arith.constant 0 : index
    %11 = vector.load %arg5[%c0_11, %c0_12] : memref<4x128xf32, #tpu.memory_space<vmem>>, vector<1x128xf32>
    %12 = vector.broadcast %11 : vector<1x128xf32> to vector<8x128xf32>
    %13 = arith.addf %10, %12 : vector<8x128xf32>
    %cst_13 = arith.constant 0.000000e+00 : f32
    %14 = vector.broadcast %cst_13 : f32 to vector<8x128xf32>
    %15 = arith.maximumf %13, %14 : vector<8x128xf32>
    %c48 = arith.constant 48 : index
    %c0_14 = arith.constant 0 : index
    %16 = vector.load %arg4[%c48, %c0_14] : memref<432x128xf32, #tpu.memory_space<vmem>>, vector<128x128xf32>
    %cst_15 = arith.constant dense<0.000000e+00> : vector<8x128xf32>
    %17 = tpu.matmul %15, %16, %cst_15 {dimension_numbers = #tpu.dot_dimension_numbers<[1], [0], [0], [1], [0, 0, 1, 1], [], []>} : vector<8x128xf32>, vector<128x128xf32>, vector<8x128xf32> -> vector<8x128xf32>
    %c1 = arith.constant 1 : index
    %c0_16 = arith.constant 0 : index
    %18 = vector.load %arg5[%c1, %c0_16] : memref<4x128xf32, #tpu.memory_space<vmem>>, vector<1x128xf32>
    %19 = vector.broadcast %18 : vector<1x128xf32> to vector<8x128xf32>
    %20 = arith.addf %17, %19 : vector<8x128xf32>
    %cst_17 = arith.constant 0.000000e+00 : f32
    %21 = vector.broadcast %cst_17 : f32 to vector<8x128xf32>
    %22 = arith.maximumf %20, %21 : vector<8x128xf32>
    %c176 = arith.constant 176 : index
    %c0_18 = arith.constant 0 : index
    %23 = vector.load %arg4[%c176, %c0_18] : memref<432x128xf32, #tpu.memory_space<vmem>>, vector<128x128xf32>
    %cst_19 = arith.constant dense<0.000000e+00> : vector<8x128xf32>
    %24 = tpu.matmul %22, %23, %cst_19 {dimension_numbers = #tpu.dot_dimension_numbers<[1], [0], [0], [1], [0, 0, 1, 1], [], []>} : vector<8x128xf32>, vector<128x128xf32>, vector<8x128xf32> -> vector<8x128xf32>
    %c2 = arith.constant 2 : index
    %c0_20 = arith.constant 0 : index
    %25 = vector.load %arg5[%c2, %c0_20] : memref<4x128xf32, #tpu.memory_space<vmem>>, vector<1x128xf32>
    %26 = vector.broadcast %25 : vector<1x128xf32> to vector<8x128xf32>
    %27 = arith.addf %24, %26 : vector<8x128xf32>
    %cst_21 = arith.constant 0.000000e+00 : f32
    %28 = vector.broadcast %cst_21 : f32 to vector<8x128xf32>
    %29 = arith.maximumf %27, %28 : vector<8x128xf32>
    %c304 = arith.constant 304 : index
    %c0_22 = arith.constant 0 : index
    %30 = vector.load %arg4[%c304, %c0_22] : memref<432x128xf32, #tpu.memory_space<vmem>>, vector<128x128xf32>
    %cst_23 = arith.constant dense<0.000000e+00> : vector<8x128xf32>
    %31 = tpu.matmul %29, %30, %cst_23 {dimension_numbers = #tpu.dot_dimension_numbers<[1], [0], [0], [1], [0, 0, 1, 1], [], []>} : vector<8x128xf32>, vector<128x128xf32>, vector<8x128xf32> -> vector<8x128xf32>
    %c3 = arith.constant 3 : index
    %c0_24 = arith.constant 0 : index
    %32 = vector.load %arg5[%c3, %c0_24] : memref<4x128xf32, #tpu.memory_space<vmem>>, vector<1x128xf32>
    %33 = vector.broadcast %32 : vector<1x128xf32> to vector<8x128xf32>
    %34 = arith.addf %31, %33 : vector<8x128xf32>
    %c0_25 = arith.constant 0 : index
    %c0_26 = arith.constant 0 : index
    %35 = vector.load %arg6[%c0_25, %c0_26] : memref<8x128xf32, #tpu.memory_space<vmem>>, vector<8x128xf32>
    tpu.vector_store %arg6[%c0_25, %c0_26], %34 {strides = array<i32>} : memref<8x128xf32, #tpu.memory_space<vmem>>, vector<8x128xf32>,
    %36 = tpu.iota {dimensions = array<i32: 1>} : vector<8x128xi32>
    %c8_i32 = arith.constant 8 : i32
    %37 = vector.broadcast %c8_i32 : i32 to vector<8x128xi32>
    %38 = arith.cmpi slt, %36, %37 : vector<8x128xi32>
    %cst_27 = arith.constant 0xFF800000 : f32
    %39 = vector.broadcast %cst_27 : f32 to vector<8x128xf32>
    %40 = arith.select %38, %34, %39 : vector<8x128xi1>, vector<8x128xf32>
    %cst_28 = arith.constant dense<0xFF800000> : vector<8xf32>
    %41 = vector.multi_reduction <maximumf>, %40, %cst_28 [1] : vector<8x128xf32> to vector<8xf32>
    %42 = vector.shape_cast %41 : vector<8xf32> to vector<8x1xf32>
    %43 = vector.broadcast %42 : vector<8x1xf32> to vector<8x128xf32>
    %44 = arith.cmpf oeq, %40, %43 : vector<8x128xf32>
    %c128_i32 = arith.constant 128 : i32
    %45 = vector.broadcast %c128_i32 : i32 to vector<8x128xi32>
    %46 = arith.select %44, %36, %45 : vector<8x128xi1>, vector<8x128xi32>
    %cst_29 = arith.constant dense<2147483647> : vector<8xi32>
    %47 = vector.multi_reduction <minsi>, %46, %cst_29 [1] : vector<8x128xi32> to vector<8xi32>
    %48 = vector.shape_cast %47 : vector<8xi32> to vector<8x1xi32>
    %c0_30 = arith.constant 0 : index
    %c0_31 = arith.constant 0 : index
    %49 = vector.load %arg7[%c0_30, %c0_31] : memref<8x1xi32, #tpu.memory_space<vmem>>, vector<8x1xi32>
    tpu.vector_store %arg7[%c0_30, %c0_31], %48 {strides = array<i32>} : memref<8x1xi32, #tpu.memory_space<vmem>>, vector<8x1xi32>,
    return
  }
  func.func @transform_0(%arg0: i32) -> (i32, i32) {
    %c0_i32 = arith.constant 0 : i32
    %c0_i32_0 = arith.constant 0 : i32
    return %arg0, %c0_i32 : i32, i32
  }
  func.func @transform_1(%arg0: i32) -> (i32, i32) {
    %c0_i32 = arith.constant 0 : i32
    %c0_i32_0 = arith.constant 0 : i32
    return %arg0, %c0_i32 : i32, i32
  }
  func.func @transform_2(%arg0: i32) -> (i32, i32) {
    %c0_i32 = arith.constant 0 : i32
    %c0_i32_0 = arith.constant 0 : i32
    return %arg0, %c0_i32 : i32, i32
  }
  func.func @transform_3(%arg0: i32) -> (i32, i32) {
    %c0_i32 = arith.constant 0 : i32
    %c0_i32_0 = arith.constant 0 : i32
    %c0_i32_1 = arith.constant 0 : i32
    return %c0_i32, %c0_i32_0 : i32, i32
  }
  func.func @transform_4(%arg0: i32) -> (i32, i32) {
    %c0_i32 = arith.constant 0 : i32
    %c0_i32_0 = arith.constant 0 : i32
    %c0_i32_1 = arith.constant 0 : i32
    return %c0_i32, %c0_i32_0 : i32, i32
  }
  func.func @transform_5(%arg0: i32) -> (i32, i32) {
    %c0_i32 = arith.constant 0 : i32
    %c0_i32_0 = arith.constant 0 : i32
    return %arg0, %c0_i32 : i32, i32
  }
  func.func @transform_6(%arg0: i32) -> (i32, i32) {
    %c0_i32 = arith.constant 0 : i32
    %c0_i32_0 = arith.constant 0 : i32
    return %arg0, %c0_i32 : i32, i32
  }
}

</mosaic_0001>

<bundles_post_ra>
// kernel: mfq_forward.1
= control target key start
LH: loop header
LB: loop body
LE: loop exit
PB: predicated region body
PF: predicated region fallthrough
CT: control target
= control target key end

     0   :  { %12 = vsyncpa [#allocation3], 0  ;;  %s465_s0 = inlined_call_operand.vmem [shape: f32[8,16], index: 0, kind: input, shape index: {}]   ;;  %s466_s1 = inlined_call_operand.hbm [shape: f32[8,8], index: 1, kind: input, shape index: {}]   ;;  %s467_s2 = inlined_call_operand.vmem [shape: f32[8,4], index: 2, kind: input, shape index: {}]   ;;  %s468_s3 = inlined_call_operand.hbm [shape: f32[432,128], index: 3, kind: input, shape index: {}]   ;;  %s469_s4 = inlined_call_operand.vmem [shape: f32[4,128], index: 4, kind: input, shape index: {}]   ;;  %s470_s5 = inlined_call_operand.hbm [shape: f32[8,128], index: 5, kind: output, shape index: {0}]   ;;  %s471_s6 = inlined_call_operand.vmem [shape: s32[8,1], index: 6, kind: output, shape index: {1}]  }
   0x1   :  { %13 = vsyncpa [#allocation6], 0 }
   0x2   :  { %14 = vsyncpa [#allocation4], 0  ;;  %s22_s23 = sshll.u32 %s466_s1, 4  ;;  %s395_s24 = smov [#allocation2]   ;;  %s23_s23 = int_to_ptr.hbm [resolvable:$true] %s22_s23 }
   0x3   :  { %s24_s25 = sshll.u32 %s395_s24, 4  ;;  %s34_s28 = sshll.u32 %s468_s3, 4  ;;  %s25_s25 = int_to_ptr.vmem [resolvable:$true] %s24_s25  ;;  %s35_s28 = int_to_ptr.hbm [resolvable:$true] %s34_s28 }
   0x4   :  { %27 = dma.hbm_to_vmem [thread:$0]  %s23_s23, 128, %s25_s25, [#allocation3]  }
   0x5   :  { %s396_s29 = smov [#allocation5]   ;;  %s397_s7 = smov 128  }
   0x6   :  { %s36_s30 = sshll.u32 %s396_s29, 4  ;;  %s398_s8 = smov 8   ;;  %s37_s30 = int_to_ptr.vmem [resolvable:$true] %s36_s30 }
   0x7   :  { %42 = dma.hbm_to_vmem [thread:$0]  %s35_s28, 6912, %s37_s30, [#allocation6], %s397_s7, %s397_s7, %s398_s8  }
   0x8   :  { %389 = dma.done.wait [#allocation3], 128  }
   0x9   :  { %390 = vsyncadd [#allocation3], 4294967168 }
   0xa   :  { %391 = dma.done.wait [#allocation6], 6912  }
   0xb   :  { %392 = vsyncadd [#allocation6], 4294960384  ;;  %vm59_vm0 = vcmask 64512   ;;  %v58_v0 = vld [vmem:[#allocation5 + $0x10] sm:$0xff]  ;;  %v54_v1 = vld [vmem:[#allocation2] sm:$0xff]  ;;  %vm112_vm1 = vcmask 1043456  }
   0xc   :  { %v57_v2 = vld [vmem:[#allocation5 + $0x8] sm:$0xff]  ;;  %78 = vmatpush.msra.mxu1 %v58_v0  ;;  %v56_v3 = vld [vmem:[#allocation5] sm:$0xff]  ;;  %v154_v7 = vld [vmem:[#allocation5 + $0x98] sm:$0xff]  ;;  %vm83_vm2 = vcmask 130048   ;;  %vm108_vm3 = vcmask 31744   ;;  %s399_s17 = smov [#allocation7]  }
   0xd   :  { %304 = vmatmul.msk.f32.vlgmr.msra.gmra.mxu1 %vm59_vm0, %v54_v1  ;;  %v156_v4 = vld [vmem:[#allocation5 + $0xa8] sm:$0xff]  ;;  %v155_v5 = vld [vmem:[#allocation5 + $0xa0] sm:$0xff]  ;;  %v153_v8 = vld [vmem:[#allocation5 + $0x90] sm:$0xff]  ;;  %s287_s18 = sshll.u32 %s399_s17, 4  ;;  %s289_s21 = sshll.u32 %s470_s5, 4  ;;  %vm280_vm7 = vcmask 7168   ;;  %s288_s18 = int_to_ptr.vmem [resolvable:$true] %s287_s18  ;;  %s290_s21 = int_to_ptr.hbm [resolvable:$true] %s289_s21 }
   0xe   :  { %101 = vmatpush.msrb.mxu1 %v57_v2  ;;  %v107_v6 = vld [vmem:[#allocation5 + $0x20] sm:$0xf]  ;;  %159 = vmatpush.msra.mxu3 %v156_v4  ;;  %v53_v9 = vld [vmem:[%s465_s0] sm:$0xff]  ;;  %v152_v11 = vld [vmem:[#allocation5 + $0x88] sm:$0xff] }
   0xf   :  { %v55_v10 = vld [vmem:[%s467_s2] sm:$0xff]  ;;  %v151_v12 = vld [vmem:[#allocation5 + $0x80] sm:$0xff]  ;;  %v149_v14 = vld [vmem:[#allocation5 + $0x70] sm:$0xff] }
  0x10   :  { %102 = vmatpush.msrb.mxu1 %v56_v3  ;;  %160 = vmatpush.msra.mxu3 %v155_v5  ;;  %v150_v13 = vld [vmem:[#allocation5 + $0x78] sm:$0xff]  ;;  %v148_v15 = vld [vmem:[#allocation5 + $0x68] sm:$0xff]  ;;  %v147_v16 = vld [vmem:[#allocation5 + $0x60] sm:$0xff] }
  0x11   :  { %v146_v17 = vld [vmem:[#allocation5 + $0x58] sm:$0xff]  ;;  %v145_v18 = vld [vmem:[#allocation5 + $0x50] sm:$0xff]  ;;  %v144_v19 = vld [vmem:[#allocation5 + $0x48] sm:$0xff] }
  0x12   :  { %306 = vmatpush.msk.msra.mxu1 %vm112_vm1, %v107_v6  ;;  %161 = vmatpush.msra.mxu3 %v154_v7  ;;  %v143_v20 = vld [vmem:[#allocation5 + $0x40] sm:$0xff]  ;;  %v142_v21 = vld [vmem:[#allocation5 + $0x38] sm:$0xff]  ;;  %v141_v22 = vld [vmem:[#allocation5 + $0x30] sm:$0xff]  ;;  %v258_v7 = vlaneseq }
  0x13   :  { %v195_v23 = vld [vmem:[#allocation5 + $0x128] sm:$0xff]  ;;  %v194_v24 = vld [vmem:[#allocation5 + $0x120] sm:$0xff]  ;;  %v193_v25 = vld [vmem:[#allocation5 + $0x118] sm:$0xff] }
  0x14   :  { %162 = vmatpush.msra.mxu3 %v153_v8  ;;  %198 = vmatpush.msra.mxu0 %v195_v23  ;;  %v192_v26 = vld [vmem:[#allocation5 + $0x110] sm:$0xff]  ;;  %v191_v27 = vld [vmem:[#allocation5 + $0x108] sm:$0xff]  ;;  %v190_v28 = vld [vmem:[#allocation5 + $0x100] sm:$0xff]  ;;  %v259_v8 = vand.u32 127, %v258_v7 }
  0x15   :  { %305 = vmatmul.msk.f32.vlgmr.msrb.gmra.mxu1 %vm83_vm2, %v53_v9  ;;  %v189_v30 = vld [vmem:[#allocation5 + $0xf8] sm:$0xff]  ;;  %v188_v31 = vld [vmem:[#allocation5 + $0xf0] sm:$0xff]  ;;  %v187_v32 = vld [vmem:[#allocation5 + $0xe8] sm:$0xff] }
  0x16   :  { %163 = vmatpush.msra.mxu3 %v152_v11  ;;  %199 = vmatpush.msra.mxu0 %v194_v24  ;;  %v186_v33 = vld [vmem:[#allocation5 + $0xe0] sm:$0xff]  ;;  %v185_v35 = vld [vmem:[#allocation5 + $0xd8] sm:$0xff]  ;;  %v184_v36 = vld [vmem:[#allocation5 + $0xd0] sm:$0xff]  ;;  %vm260_vm4 = vcmp.lt.s32.totalorder %v259_v8, 8 }
  0x17   :  { %v183_v37 = vld [vmem:[#allocation5 + $0xc8] sm:$0xff]  ;;  %v313_v39 = vld [vmem:[%s469_s4] ss:$0 sm:$0xff]  ;;  %v182_v44 = vld [vmem:[#allocation5 + $0xc0] sm:$0xff] }
  0x18   :  { %164 = vmatpush.msra.mxu3 %v151_v12  ;;  %200 = vmatpush.msra.mxu0 %v193_v25  ;;  %v181_v45 = vld [vmem:[#allocation5 + $0xb8] sm:$0xff]  ;;  %v180_v46 = vld [vmem:[#allocation5 + $0xb0] sm:$0xff]  ;;  %v234_v47 = vld [vmem:[#allocation5 + $0x1a8] sm:$0xff] }
  0x19   :  { %v233_v48 = vld [vmem:[#allocation5 + $0x1a0] sm:$0xff]  ;;  %237 = vmatpush.msra.mxu2 %v234_v47  ;;  %v232_v49 = vld [vmem:[#allocation5 + $0x198] sm:$0xff]  ;;  %v231_v50 = vld [vmem:[#allocation5 + $0x190] sm:$0xff] }
  0x1a   :  { %165 = vmatpush.msra.mxu3 %v150_v13  ;;  %201 = vmatpush.msra.mxu0 %v192_v26  ;;  %v230_v51 = vld [vmem:[#allocation5 + $0x188] sm:$0xff]  ;;  %v229_v52 = vld [vmem:[#allocation5 + $0x180] sm:$0xff]  ;;  %v228_v53 = vld [vmem:[#allocation5 + $0x178] sm:$0xff] }
  0x1b   :  { %238 = vmatpush.msra.mxu2 %v233_v48  ;;  %v227_v54 = vld [vmem:[#allocation5 + $0x170] sm:$0xff]  ;;  %v226_v55 = vld [vmem:[#allocation5 + $0x168] sm:$0xff]  ;;  %v225_v56 = vld [vmem:[#allocation5 + $0x160] sm:$0xff] }
  0x1c   :  { %166 = vmatpush.msra.mxu3 %v149_v14  ;;  %202 = vmatpush.msra.mxu0 %v191_v27  ;;  %v224_v57 = vld [vmem:[#allocation5 + $0x158] sm:$0xff]  ;;  %v223_v58 = vld [vmem:[#allocation5 + $0x150] sm:$0xff]  ;;  %v222_v59 = vld [vmem:[#allocation5 + $0x148] sm:$0xff] }
  0x1d   :  { %307 = vmatmul.msk.f32.vlgmr.msra.gmra.mxu1 %vm108_vm3, %v55_v10  ;;  %239 = vmatpush.msra.mxu2 %v232_v49  ;;  %v314_v60 = vld [vmem:[%s469_s4 + $0x1] ss:$0 sm:$0xff]  ;;  %v221_v0 = vld [vmem:[#allocation5 + $0x140] sm:$0xff]  ;;  %v219_v2 = vld [vmem:[#allocation5 + $0x130] sm:$0xff] }
  0x1e   :  { %167 = vmatpush.msra.mxu3 %v148_v15  ;;  %203 = vmatpush.msra.mxu0 %v190_v28  ;;  %v220_v1 = vld [vmem:[#allocation5 + $0x138] sm:$0xff] }
  0x1f   :  { %240 = vmatpush.msra.mxu2 %v231_v50  ;;  %v315_v3 = vld [vmem:[%s469_s4 + $0x2] ss:$0 sm:$0xff]  ;;  %v316_v9 = vld [vmem:[%s469_s4 + $0x3] ss:$0 sm:$0xff] }
  0x20   :  { %168 = vmatpush.msra.mxu3 %v147_v16  ;;  %204 = vmatpush.msra.mxu0 %v189_v30 }
  0x21   :  { %241 = vmatpush.msra.mxu2 %v230_v51 }
  0x22   :  { %169 = vmatpush.msra.mxu3 %v146_v17  ;;  %205 = vmatpush.msra.mxu0 %v188_v31 }
  0x23   :  { %242 = vmatpush.msra.mxu2 %v229_v52 }
  0x24   :  { %170 = vmatpush.msra.mxu3 %v145_v18  ;;  %206 = vmatpush.msra.mxu0 %v187_v32 }
  0x25   :  { %243 = vmatpush.msra.mxu2 %v228_v53 }
  0x26   :  { %171 = vmatpush.msra.mxu3 %v144_v19  ;;  %207 = vmatpush.msra.mxu0 %v186_v33 }
  0x27   :  { %244 = vmatpush.msra.mxu2 %v227_v54 }
  0x28   :  { %172 = vmatpush.msra.mxu3 %v143_v20  ;;  %208 = vmatpush.msra.mxu0 %v185_v35 }
  0x29   :  { %245 = vmatpush.msra.mxu2 %v226_v55 }
  0x2a   :  { %173 = vmatpush.msra.mxu3 %v142_v21  ;;  %209 = vmatpush.msra.mxu0 %v184_v36 }
  0x2b   :  { %246 = vmatpush.msra.mxu2 %v225_v56 }
  0x2c   :  { %174 = vmatpush.msra.mxu3 %v141_v22  ;;  %210 = vmatpush.msra.mxu0 %v183_v37 }
  0x2d   :  { %247 = vmatpush.msra.mxu2 %v224_v57 }
  0x2e   :  { %211 = vmatpush.msra.mxu0 %v182_v44 }
  0x2f   :  { %248 = vmatpush.msra.mxu2 %v223_v58 }
  0x30   :  { %212 = vmatpush.msra.mxu0 %v181_v45 }
  0x31   :  { %249 = vmatpush.msra.mxu2 %v222_v59 }
  0x32   :  { %213 = vmatpush.msra.mxu0 %v180_v46 }
  0x33   :  { %250 = vmatpush.msra.mxu2 %v221_v0 }
  0x35   :  { %251 = vmatpush.msra.mxu2 %v220_v1 }
  0x37   :  { %252 = vmatpush.msra.mxu2 %v219_v2 }
  0x8a   :  { %v80_v29 = vpop.f32.mrf.mxu1 }
  0x92   :  { %v104_v34 = vpop.f32.mrf.mxu1 }
  0x93   :  { %v105_v38 = vadd.f32 %v104_v34, %v80_v29 }
  0x9a   :  { %v133_v40 = vpop.f32.mrf.mxu1 }
  0x9b   :  { %v136_v41 = vadd.f32 %v133_v40, %v105_v38 }
  0x9d   :  { %v139_v42 = vadd.f32 %v313_v39, %v136_v41 }
  0x9f   :  { %v140_v43 = vmax.f32 %v139_v42, 0.0 }
  0xa1   :  { %175 = vmatmul.f32.vlgmr.msra.gmra.mxu3 %v140_v43 }
 0x124   :  { %v176_v61 = vpop.f32.mrf.mxu3 }
 0x125   :  { %v177_v62 = vadd.f32 %v314_v60, %v176_v61 }
 0x127   :  { %v179_v63 = vmax.f32 %v177_v62, 0.0 }
 0x129   :  { %214 = vmatmul.f32.vlgmr.msra.gmra.mxu0 %v179_v63 }
 0x1a6   :  { %v215_v4 = vpop.f32.mrf.mxu0 }
 0x1a7   :  { %v216_v5 = vadd.f32 %v315_v3, %v215_v4 }
 0x1a9   :  { %v218_v6 = vmax.f32 %v216_v5, 0.0 }
 0x1ab   :  { %253 = vmatmul.f32.vlgmr.msra.gmra.mxu2 %v218_v6 }
 0x22e   :  { %v254_v10 = vpop.f32.mrf.mxu2 }
 0x22f   :  { %v255_v11 = vadd.f32 %v316_v9, %v254_v10 }
 0x231   :  { %257 = vst [vmem:[#allocation7] sm:$0xff] %v255_v11  ;;  %v261_v12 = vsel %vm260_vm4, %v255_v11, -inf }
 0x232   :  { %262 = vmax.xlane.f32.xlu0 %v261_v12  ;;  %292 = dma.vmem_to_hbm [thread:$0]  %s288_s18, 128, %s290_s21, [#allocation4]  }
 0x2a5   :  { %v263_v13 = vpop.xlane.xlu0 %262 }
 0x2a6   :  { %vm264_vm5 = vcmp.eq.f32.partialorder %v261_v12, %v263_v13 }
 0x2a7   :  { %v265_v14 = vsel %vm264_vm5, %v259_v8, 128 }
 0x2a8   :  { %v267_v15 = vshra.s32 %v265_v14, 16  ;;  %v266_v17 = vand.u32 65535, %v265_v14 }
 0x2aa   :  { %v269_v16 = vcvt.s32.f32 %v267_v15  ;;  %v268_v19 = vcvt.s32.f32 %v266_v17 }
 0x2ac   :  { %270 = vmin.xlane.f32.xlu0 %v269_v16 }
 0x31f   :  { %v271_v18 = vpop.xlane.xlu0 %270 }
 0x320   :  { %vm272_vm6 = vcmp.eq.f32.partialorder %v269_v16, %v271_v18  ;;  %v277_v21 = vcvt.f32.s32 %v271_v18 }
 0x321   :  { %v273_v20 = vsel %vm272_vm6, %v268_v19, inf }
 0x322   :  { %274 = vmin.xlane.f32.xlu1 %v273_v20  ;;  %v278_v23 = vshll.u32 %v277_v21, 16 }
 0x395   :  { %v275_v22 = vpop.xlane.xlu1 %274 }
 0x396   :  { %v276_v24 = vcvt.f32.s32 %v275_v22 }
 0x398   :  { %v279_v25 = vadd.s32 %v278_v23, %v276_v24 }
 0x39a   :  { %281 = vst.msk [vmem:[%s471_s6] sm:$0xff] %vm280_vm7, %v279_v25 }
 0x39b   :  { %393 = dma.done.wait [#allocation4], 128  }
 0x39c   :  { %394 = vsyncadd [#allocation4], 4294967168 }
 0x39d   :  { %301 = vsyncpa [#allocation3], 1 }
 0x39e   :  { %302 = vsyncpa [#allocation6], 1 }
 0x39f   :  { %303 = vsyncpa [#allocation4], 1 }

</bundles_post_ra>
